<compile_context>
chip_gen: v7x
topology: tpu7x:2x2x1
jax: 0.10.0
libtpu: 0.0.40
codegen_flags: <defaults>
</compile_context>

<pallas_src>
import functools

import jax
import jax.numpy as jnp
from jax.experimental import pallas as pl
from jax.experimental.pallas import tpu as pltpu

X_IN = 4
H = 20
X_OUT = 20   # == H; the packed-weight layout for layers 1..3 relies on this.
LANE = 128


def _softplus(x):
    # Stable softplus; for x > 20 the correction term is < 2e-9, so this
    # matches torch.nn.Softplus's linear-threshold behaviour well within fp32.
    return jnp.maximum(x, 0.0) + jnp.log1p(jnp.exp(-jnp.abs(x)))


def _mlp_kernel(x_ref, w0_ref, w_ref, b_ref, o_ref):
    # x_ref : (X_IN, tile_n)  feature-major, lane-dense batch tile
    # w0_ref: (H, X_IN)       layer-0 weight (no padding needed)
    # w_ref : (3, H, H)       packed weights for layers 1..3
    # b_ref : (4, H, 1)       packed biases (broadcast along lanes)
    # o_ref : (X_OUT, tile_n)
    h = jnp.dot(w0_ref[...], x_ref[...],
                preferred_element_type=jnp.float32) + b_ref[0]
    h = _softplus(h)
    for layer in range(3):
        h = jnp.dot(w_ref[layer], h,
                    preferred_element_type=jnp.float32) + b_ref[layer + 1]
        if layer < 2:
            h = _softplus(h)
    o_ref[...] = h.astype(o_ref.dtype)


def model_latent_f(x, params, *, tile_n=1024):
    """Forward pass of ModelLatentF.

    x: (N, X_IN) float32 (any N; the batch is padded internally)
    params: dict with "w0" (H, X_IN), "w" (3, H, H), "b" (4, H, 1).
    Returns (N, X_OUT) float32.
    """
    N, d = x.shape
    assert d == X_IN
    w0, w, b = params["w0"], params["w"], params["b"]

    # Lane-align the batch and guarantee >= 2 grid steps (so "parallel" can
    # shard across both TensorCores on v7x).
    n_pad = max(2 * LANE, pl.cdiv(N, LANE) * LANE)
    tile = max(LANE, (min(tile_n, n_pad // 2) // LANE) * LANE)
    n_pad = pl.cdiv(n_pad, tile) * tile
    grid = (n_pad // tile,)

    # Batch-on-lanes layout: (X_IN, n_pad). Keeping the native 4 features
    # (instead of zero-padding to 20) cuts activation-read HBM traffic 5x.
    xt = jnp.zeros((X_IN, n_pad), dtype=jnp.float32)
    xt = xt.at[:, :N].set(x.T.astype(jnp.float32))

    # VMEM per step: ~(4 + 20) * tile * 4B * 2 buffers (<< limit) + tiny params.
    vmem_limit = 32 * 1024 * 1024

    out_t = pl.pallas_call(
        _mlp_kernel,
        out_shape=jax.ShapeDtypeStruct((X_OUT, n_pad), jnp.float32),
        grid_spec=pltpu.PrefetchScalarGridSpec(
            num_scalar_prefetch=0,
            grid=grid,
            in_specs=[
                pl.BlockSpec((X_IN, tile), lambda i: (0, i)),     # x tile
                pl.BlockSpec((H, X_IN), lambda i: (0, 0)),        # W0
                pl.BlockSpec((3, H, H), lambda i: (0, 0, 0)),     # W1..3 packed
                pl.BlockSpec((4, H, 1), lambda i: (0, 0, 0)),     # biases
            ],
            out_specs=pl.BlockSpec((X_OUT, tile), lambda i: (0, i)),
        ),
        compiler_params=pltpu.CompilerParams(
            dimension_semantics=("parallel",),
            vmem_limit_bytes=vmem_limit,
        ),
        cost_estimate=pl.CostEstimate(
            flops=2 * n_pad * (H * X_IN + 3 * H * H),
            transcendentals=2 * 3 * H * n_pad,
            bytes_accessed=(X_IN + X_OUT) * n_pad * 4
            + int(w0.size + w.size + b.size) * 4,
        ),
    )(xt, w0, w, b)

    # Back to the module's native (N, X_OUT) layout.
    return out_t[:, :N].T


def init_params(key):
    """Deterministic init mimicking torch.nn.Linear defaults
    (U(-1/sqrt(fan_in), 1/sqrt(fan_in)) for weights and biases)."""
    fan_ins = [X_IN, H, H, H]
    fan_outs = [H, H, H, X_OUT]
    w0 = jnp.zeros((H, X_IN), dtype=jnp.float32)
    w = jnp.zeros((3, H, H), dtype=jnp.float32)   # (layer-1, out, in)
    b = jnp.zeros((4, H, 1), dtype=jnp.float32)
    keys = jax.random.split(key, 2 * 4)
    for l in range(4):
        bound = 1.0 / (float(fan_ins[l]) ** 0.5)
        w_l = jax.random.uniform(keys[2 * l], (fan_outs[l], fan_ins[l]),
                                 minval=-bound, maxval=bound,
                                 dtype=jnp.float32)
        b_l = jax.random.uniform(keys[2 * l + 1], (fan_outs[l],),
                                 minval=-bound, maxval=bound,
                                 dtype=jnp.float32)
        if l == 0:
            w0 = w_l
        else:
            w = w.at[l - 1].set(w_l)
        b = b.at[l, :, 0].set(b_l)
    return {"w0": w0, "w": w, "b": b}


def _reference(x, params):
    """Plain-JAX reference (batch-major layout) for a sanity check."""
    w0, w, b = params["w0"], params["w"], params["b"]
    h = x.astype(jnp.float32) @ w0.T + b[0, :, 0]
    h = _softplus(h)
    for l in range(3):
        h = h @ w[l].T + b[l + 1, :, 0]
        if l < 2:
            h = _softplus(h)
    return h


if __name__ == "__main__":
    key = jax.random.PRNGKey(0)
    pkey, xkey = jax.random.split(key)

    params = init_params(pkey)

    N = 300  # deliberately not a multiple of 128 to exercise batch padding
    x = jax.random.normal(xkey, (N, X_IN), dtype=jnp.float32)

    fwd = jax.jit(functools.partial(model_latent_f, tile_n=1024))
    out = jax.block_until_ready(fwd(x, params))

    ref = _reference(x, params)
    assert out.shape == (N, X_OUT)
    assert jnp.allclose(out, ref, atol=1e-4, rtol=1e-4), "mismatch vs reference"

    print("KERNEL_OK")
</pallas_src>

<mosaic_0001>
module attributes {stable_mosaic.version = 11 : i64} {
  func.func @_mlp_kernel(%arg0: i32, %arg1: memref<4x128xf32, #tpu.memory_space<vmem>>, %arg2: memref<20x4xf32, #tpu.memory_space<vmem>>, %arg3: memref<3x20x20xf32, #tpu.memory_space<vmem>>, %arg4: memref<4x20x1xf32, #tpu.memory_space<vmem>>, %arg5: memref<20x128xf32, #tpu.memory_space<vmem>>) attributes {dimension_semantics = [#tpu.dimension_semantics<parallel>], iteration_bounds = array<i64: 3>, scalar_prefetch = 0 : i64, scratch_operands = 0 : i64, tpu.core_type = #tpu.core_type<tc>, window_params = [{transform_indices = @transform_0, window_bounds = array<i64: 4, 128>}, {pipeline_mode = #tpu.pipeline_mode<synchronous>, transform_indices = @transform_1, window_bounds = array<i64: 20, 4>}, {pipeline_mode = #tpu.pipeline_mode<synchronous>, transform_indices = @transform_2, window_bounds = array<i64: 3, 20, 20>}, {pipeline_mode = #tpu.pipeline_mode<synchronous>, transform_indices = @transform_3, window_bounds = array<i64: 4, 20, 1>}, {transform_indices = @transform_4, window_bounds = array<i64: 20, 128>}]} {
    %c0 = arith.constant 0 : index
    %c0_0 = arith.constant 0 : index
    %0 = vector.load %arg2[%c0, %c0_0] : memref<20x4xf32, #tpu.memory_space<vmem>>, vector<20x4xf32>
    %c0_1 = arith.constant 0 : index
    %c0_2 = arith.constant 0 : index
    %1 = vector.load %arg1[%c0_1, %c0_2] : memref<4x128xf32, #tpu.memory_space<vmem>>, vector<4x128xf32>
    %cst = arith.constant dense<0.000000e+00> : vector<20x128xf32>
    %2 = tpu.matmul %0, %1, %cst {dimension_numbers = #tpu.dot_dimension_numbers<[1], [0], [0], [1], [0, 0, 1, 1], [], []>} : vector<20x4xf32>, vector<4x128xf32>, vector<20x128xf32> -> vector<20x128xf32>
    %c0_3 = arith.constant 0 : index
    %c0_4 = arith.constant 0 : index
    %c0_5 = arith.constant 0 : index
    %3 = vector.load %arg4[%c0_3, %c0_4, %c0_5] : memref<4x20x1xf32, #tpu.memory_space<vmem>>, vector<1x20x1xf32>
    %4 = vector.shape_cast %3 : vector<1x20x1xf32> to vector<20x1xf32>
    %5 = vector.broadcast %4 : vector<20x1xf32> to vector<20x128xf32>
    %6 = arith.addf %2, %5 : vector<20x128xf32>
    %cst_6 = arith.constant 0.000000e+00 : f32
    %7 = vector.broadcast %cst_6 : f32 to vector<20x128xf32>
    %8 = arith.maximumf %6, %7 : vector<20x128xf32>
    %9 = math.absf %6 : vector<20x128xf32>
    %cst_7 = arith.constant 0.000000e+00 : f32
    %10 = vector.broadcast %cst_7 : f32 to vector<20x128xf32>
    %11 = arith.subf %10, %9 : vector<20x128xf32>
    %12 = math.exp %11 : vector<20x128xf32>
    %13 = math.log1p %12 : vector<20x128xf32>
    %14 = arith.addf %8, %13 : vector<20x128xf32>
    %c0_8 = arith.constant 0 : index
    %c0_9 = arith.constant 0 : index
    %c0_10 = arith.constant 0 : index
    %15 = vector.load %arg3[%c0_8, %c0_9, %c0_10] : memref<3x20x20xf32, #tpu.memory_space<vmem>>, vector<1x20x20xf32>
    %16 = vector.shape_cast %15 : vector<1x20x20xf32> to vector<20x20xf32>
    %cst_11 = arith.constant dense<0.000000e+00> : vector<20x128xf32>
    %17 = tpu.matmul %16, %14, %cst_11 {dimension_numbers = #tpu.dot_dimension_numbers<[1], [0], [0], [1], [0, 0, 1, 1], [], []>} : vector<20x20xf32>, vector<20x128xf32>, vector<20x128xf32> -> vector<20x128xf32>
    %c1 = arith.constant 1 : index
    %c0_12 = arith.constant 0 : index
    %c0_13 = arith.constant 0 : index
    %18 = vector.load %arg4[%c1, %c0_12, %c0_13] : memref<4x20x1xf32, #tpu.memory_space<vmem>>, vector<1x20x1xf32>
    %19 = vector.shape_cast %18 : vector<1x20x1xf32> to vector<20x1xf32>
    %20 = vector.broadcast %19 : vector<20x1xf32> to vector<20x128xf32>
    %21 = arith.addf %17, %20 : vector<20x128xf32>
    %cst_14 = arith.constant 0.000000e+00 : f32
    %22 = vector.broadcast %cst_14 : f32 to vector<20x128xf32>
    %23 = arith.maximumf %21, %22 : vector<20x128xf32>
    %24 = math.absf %21 : vector<20x128xf32>
    %cst_15 = arith.constant 0.000000e+00 : f32
    %25 = vector.broadcast %cst_15 : f32 to vector<20x128xf32>
    %26 = arith.subf %25, %24 : vector<20x128xf32>
    %27 = math.exp %26 : vector<20x128xf32>
    %28 = math.log1p %27 : vector<20x128xf32>
    %29 = arith.addf %23, %28 : vector<20x128xf32>
    %c1_16 = arith.constant 1 : index
    %c0_17 = arith.constant 0 : index
    %c0_18 = arith.constant 0 : index
    %30 = vector.load %arg3[%c1_16, %c0_17, %c0_18] : memref<3x20x20xf32, #tpu.memory_space<vmem>>, vector<1x20x20xf32>
    %31 = vector.shape_cast %30 : vector<1x20x20xf32> to vector<20x20xf32>
    %cst_19 = arith.constant dense<0.000000e+00> : vector<20x128xf32>
    %32 = tpu.matmul %31, %29, %cst_19 {dimension_numbers = #tpu.dot_dimension_numbers<[1], [0], [0], [1], [0, 0, 1, 1], [], []>} : vector<20x20xf32>, vector<20x128xf32>, vector<20x128xf32> -> vector<20x128xf32>
    %c2 = arith.constant 2 : index
    %c0_20 = arith.constant 0 : index
    %c0_21 = arith.constant 0 : index
    %33 = vector.load %arg4[%c2, %c0_20, %c0_21] : memref<4x20x1xf32, #tpu.memory_space<vmem>>, vector<1x20x1xf32>
    %34 = vector.shape_cast %33 : vector<1x20x1xf32> to vector<20x1xf32>
    %35 = vector.broadcast %34 : vector<20x1xf32> to vector<20x128xf32>
    %36 = arith.addf %32, %35 : vector<20x128xf32>
    %cst_22 = arith.constant 0.000000e+00 : f32
    %37 = vector.broadcast %cst_22 : f32 to vector<20x128xf32>
    %38 = arith.maximumf %36, %37 : vector<20x128xf32>
    %39 = math.absf %36 : vector<20x128xf32>
    %cst_23 = arith.constant 0.000000e+00 : f32
    %40 = vector.broadcast %cst_23 : f32 to vector<20x128xf32>
    %41 = arith.subf %40, %39 : vector<20x128xf32>
    %42 = math.exp %41 : vector<20x128xf32>
    %43 = math.log1p %42 : vector<20x128xf32>
    %44 = arith.addf %38, %43 : vector<20x128xf32>
    %c2_24 = arith.constant 2 : index
    %c0_25 = arith.constant 0 : index
    %c0_26 = arith.constant 0 : index
    %45 = vector.load %arg3[%c2_24, %c0_25, %c0_26] : memref<3x20x20xf32, #tpu.memory_space<vmem>>, vector<1x20x20xf32>
    %46 = vector.shape_cast %45 : vector<1x20x20xf32> to vector<20x20xf32>
    %cst_27 = arith.constant dense<0.000000e+00> : vector<20x128xf32>
    %47 = tpu.matmul %46, %44, %cst_27 {dimension_numbers = #tpu.dot_dimension_numbers<[1], [0], [0], [1], [0, 0, 1, 1], [], []>} : vector<20x20xf32>, vector<20x128xf32>, vector<20x128xf32> -> vector<20x128xf32>
    %c3 = arith.constant 3 : index
    %c0_28 = arith.constant 0 : index
    %c0_29 = arith.constant 0 : index
    %48 = vector.load %arg4[%c3, %c0_28, %c0_29] : memref<4x20x1xf32, #tpu.memory_space<vmem>>, vector<1x20x1xf32>
    %49 = vector.shape_cast %48 : vector<1x20x1xf32> to vector<20x1xf32>
    %50 = vector.broadcast %49 : vector<20x1xf32> to vector<20x128xf32>
    %51 = arith.addf %47, %50 : vector<20x128xf32>
    %c0_30 = arith.constant 0 : index
    %c0_31 = arith.constant 0 : index
    %52 = vector.load %arg5[%c0_30, %c0_31] : memref<20x128xf32, #tpu.memory_space<vmem>>, vector<20x128xf32>
    tpu.vector_store %arg5[%c0_30, %c0_31], %51 {strides = array<i32>} : memref<20x128xf32, #tpu.memory_space<vmem>>, vector<20x128xf32>,
    return
  }
  func.func @transform_0(%arg0: i32) -> (i32, i32) {
    %c0_i32 = arith.constant 0 : i32
    %c0_i32_0 = arith.constant 0 : i32
    return %c0_i32, %arg0 : i32, i32
  }
  func.func @transform_1(%arg0: i32) -> (i32, i32) {
    %c0_i32 = arith.constant 0 : i32
    %c0_i32_0 = arith.constant 0 : i32
    %c0_i32_1 = arith.constant 0 : i32
    return %c0_i32, %c0_i32_0 : i32, i32
  }
  func.func @transform_2(%arg0: i32) -> (i32, i32, i32) {
    %c0_i32 = arith.constant 0 : i32
    %c0_i32_0 = arith.constant 0 : i32
    %c0_i32_1 = arith.constant 0 : i32
    %c0_i32_2 = arith.constant 0 : i32
    return %c0_i32, %c0_i32_0, %c0_i32_1 : i32, i32, i32
  }
  func.func @transform_3(%arg0: i32) -> (i32, i32, i32) {
    %c0_i32 = arith.constant 0 : i32
    %c0_i32_0 = arith.constant 0 : i32
    %c0_i32_1 = arith.constant 0 : i32
    %c0_i32_2 = arith.constant 0 : i32
    return %c0_i32, %c0_i32_0, %c0_i32_1 : i32, i32, i32
  }
  func.func @transform_4(%arg0: i32) -> (i32, i32) {
    %c0_i32 = arith.constant 0 : i32
    %c0_i32_0 = arith.constant 0 : i32
    return %c0_i32, %arg0 : i32, i32
  }
}

</mosaic_0001>

<bundles_post_ra>
// kernel: model_latent_f.1
= control target key start
LH: loop header
LB: loop body
LE: loop exit
PB: predicated region body
PF: predicated region fallthrough
CT: control target
= control target key end

     0   :  { %s1134_s15 = smov 0   ;;  %s1136_s16 = smov 0   ;;  %s1304_s0 = inlined_call_operand.vmem [shape: f32[4,384], index: 0, kind: input, shape index: {}]   ;;  %s1305_s1 = inlined_call_operand.vmem [shape: f32[20,4], index: 1, kind: input, shape index: {}]   ;;  %s1306_s2 = inlined_call_operand.vmem [shape: f32[3,20,20], index: 2, kind: input, shape index: {}]   ;;  %s1307_s3 = inlined_call_operand.vmem [shape: f32[4,20,1], index: 3, kind: input, shape index: {}]   ;;  %s1308_s4 = inlined_call_operand.vmem [shape: f32[20,384], index: 4, kind: output, shape index: {}]  }
   0x1   :  { %s1138_s17 = smov 0  }
   0x2 LB: > { %s1147_s18 = sadd.s32 4294967295, %s1103_s17   ;;  %s1149_s19 = sadd.s32 1, %s1103_s17   ;;  %s1103_s17 = sphi %s1138_s17, %s1312_s17   ;;  %s1099_s16 = sphi %s1136_s16, %s1311_s16   ;;  %s1095_s15 = sphi %s1134_s15, %s1310_s15  }
   0x3   : > { %s107_s20 = ssub.s32 %s1103_s17, %s1149_s19  ;;  %s110_s21 = sadd.s32 1, %s1099_s16 }
   0x4   : > { %p108_p0 = scmp.eq.s32.totalorder %s107_s20, 0  ;;  %p120_p1 = scmp.ne.s32.totalorder %s1099_s16, %s1095_s15 }
   0x5   : > { %p121_p2 = scmp.eq.s32.totalorder %s1147_s18, 2  ;;  %p891_p3 = scmp.ge.s32.totalorder %s1103_s17, 1 }
   0x6   : > { %s1157_s22 = scalar_select %p108_p0, %s1099_s16, %s110_s21  }
   0x7   : > { %p1159_p4 = por %p121_p2, %p120_p1  ;;  %p161_p5 = scmp.lt.s32.totalorder %s1103_s17, 4 }
   0x9   : > { %p162_p6 = pnand %p891_p3, %p161_p5 }
   0xa   : > { %p185_p7 = scmp.lt.s32.totalorder (!%p162_p6), %s1147_s18, 2  ;;  %v1105_v0 = vmov (!%p162_p6), 0.0   ;;  %vm1106_vm0 = vmmov (!%p162_p6), 0   ;;  %v193_v1 = vld [vmem:[%s1307_s3] sm:$0xff] (!%p162_p6)  ;;  %v1107_v2 = vmov (!%p162_p6), 0   ;;  %vm221_vm1 = vcmask (!%p162_p6), 1043456  }
   0xb   : > { %165 = sbr.rel (%p162_p6) target bundleno = 1035 (0x40b), region = 36  ;;  %949 = vmatprep.subr.mxu0 (!%p162_p6), %v1105_v0  ;;  %951 = vmatprep.mubr.msk.f32.mxu0 (!%p162_p6), %vm1106_vm0, %v1105_v0  ;;  %v195_v3 = vld [vmem:[%s1307_s3 + $0x10] sm:$0xf] (!%p162_p6)  ;;  %v194_v4 = vld [vmem:[%s1307_s3 + $0x8] sm:$0xff] (!%p162_p6)  ;;  %v189_v5 = vld [vmem:[%s1305_s1] sm:$0xff] (!%p162_p6)  ;;  %vm211_vm2 = vcmask (!%p162_p6), 31744  }
   0xc   : > { %1043 = vset.pattern.permute.xlu0 (!%p162_p6), %v1107_v2  ;;  %1044 = vset.pattern.permute.xlu1 (!%p162_p6), %v1107_v2  ;;  %v897_v6 = vld [vmem:[%s1307_s3 + $0x18] sm:$0xff] (!%p162_p6)  ;;  %v898_v8 = vld [vmem:[%s1307_s3 + $0x20] sm:$0xff] (!%p162_p6)  ;;  %v190_v9 = vld [vmem:[%s1305_s1 + $0x8] sm:$0xff] (!%p162_p6)  ;;  %v1108_v18 = vmov (!%p162_p6), 0.0|0.0   ;;  %vm372_vm6 = vcmask (!%p162_p6), 162816   ;;  %s182_s11 = sand.u32 (!%p162_p6), 1, %s1095_s15  }
   0xd   : > { %198 = vperm.xlu0 (!%p162_p6), %1043, %v193_v1   ;;  %208 = vperm.xlu1 (!%p162_p6), %1044, %v195_v3   ;;  %v899_v10 = vld [vmem:[%s1307_s3 + $0x28] sm:$0xf] (!%p162_p6)  ;;  %v907_v11 = vld [vmem:[%s1307_s3 + $0x30] sm:$0xff] (!%p162_p6)  ;;  %v908_v13 = vld [vmem:[%s1307_s3 + $0x38] sm:$0xff] (!%p162_p6)  ;;  %s1014_s12 = smul.u32 (!%p162_p6), 24, %s182_s11 }
   0xe   : > { %966 = vmatprep.mubr.msk.f32.mxu1 (!%p162_p6), %vm1106_vm0, %v1105_v0  ;;  %v191_v12 = vld [vmem:[%s1305_s1 + $0x10] sm:$0xf] (!%p162_p6)  ;;  %v909_v14 = vld [vmem:[%s1307_s3 + $0x40] sm:$0xf] (!%p162_p6)  ;;  %v917_v15 = vld [vmem:[%s1307_s3 + $0x48] sm:$0xff] (!%p162_p6)  ;;  %1005 = vmatprep.subr.bf16.mxu1 (!%p162_p6), %v1108_v18 }
   0xf   : > { %v918_v16 = vld [vmem:[%s1307_s3 + $0x50] sm:$0xff] (!%p162_p6)  ;;  %v919_v17 = vld [vmem:[%s1307_s3 + $0x58] sm:$0xf] (!%p162_p6)  ;;  %s184_s13 = scalar_lea.vmem (!%p162_p6), [#allocation2], %s1014_s12 }
  0x11   : > { %203 = vperm.xlu0 (!%p162_p6), %1043, %v194_v4   ;;  %359 = vperm.xlu1 (!%p162_p6), %1044, %v897_v6  }
  0x12   : > { %s186_s26 = scalar_select %p185_p7, %s1147_s18, 2 }
  0x13   : > { %s924_s15 = sshll.u32 (%p1159_p4), %s1147_s18, 3 }
  0x14   : > { %s892_s29 = sshll.u32 %s186_s26, 2  ;;  %s796_s20 = scalar_lea.vmem (%p1159_p4), %s1308_s4, %s924_s15 }
  0x15   : > { %s188_s8 = scalar_lea.vmem %s1304_s0, %s892_s29  ;;  %364 = vperm.xlu0 %1043, %v898_v8   ;;  %369 = vperm.xlu1 %1044, %v899_v10  }
  0x16   : > { %v192_v7 = vld [vmem:[%s188_s8] sm:$0xf] }
  0x17   : > { %950 = vmatpush3.msk.msra.mxu0 %vm221_vm1, %v192_v7 }
  0x18   : > { %952 = vmatmul.mubr.msk.f32.vlgmr.msra.gmra.mrb[0].mxu0 %vm211_vm2, %v189_v5  ;;  %1008 = vmatprep.subr.bf16.mxu0 %v1108_v18 }
  0x19   : > { %954 = vmatprep.mubr.msk.f32.mxu0 %vm1106_vm0, %v1105_v0  ;;  %520 = vperm.xlu0 %1043, %v907_v11   ;;  %v350_v11 = vld [vmem:[%s1306_s2] sm:$0xff] }
  0x1a   : > { %525 = vperm.xlu1 %1044, %v908_v13   ;;  %v352_v13 = vld [vmem:[%s1306_s2 + $0x10] sm:$0xf] }
  0x1c   : > { %955 = vmatmul.mubr.msk.f32.gmra.mrb[2].mxu0 %vm211_vm2, %v190_v9 }
  0x1d   : > { %957 = vmatprep.mubr.msk.f32.mxu0 %vm1106_vm0, %v1105_v0  ;;  %530 = vperm.xlu0 %1043, %v909_v14  }
  0x1e   : > { %680 = vperm.xlu1 %1044, %v917_v15  }
  0x20   : > { %958 = vmatmul.mubr.msk.f32.gmra.mrb[4].mxu0 %vm211_vm2, %v191_v12  ;;  %v351_v12 = vld [vmem:[%s1306_s2 + $0x8] sm:$0xff] }
  0x21   : > { %981 = vmatprep.mubr.msk.f32.mxu0 %vm1106_vm0, %v1105_v0  ;;  %685 = vperm.xlu0 %1043, %v918_v16  }
  0x22   : > { %690 = vperm.xlu1 %1044, %v919_v17  }
  0x8c   : > { %v199_v19 = vpop.permute.xlu0 %198  ;;  %v209_v31 = vpop.permute.xlu1 %208 }
  0x90   : > { %v204_v24 = vpop.permute.xlu0 %203  ;;  %v360_v14 = vpop.permute.xlu1 %359 }
  0xeb   : > { %v291_v20 = vpop.f32.mrb[0].mxu0 }
  0xec   : > { %v292_v21 = vadd.f32 %v291_v20, %v199_v19  ;;  %v953_v22 = vpop.f32.mrb[1].mxu0  ;;  %v365_v19 = vpop.permute.xlu0 %364 }
  0xee   : > { %v308_v23 = vand.u32 2147483647, %v292_v21  ;;  %v305_v61 = vmax.f32 %v292_v21, 0.0 }
  0xef   : > { %v296_v25 = vpop.f32.mrb[2].mxu0 }
  0xf0   : > { %v311_v26 = vsub.f32 0.0, %v308_v23  ;;  %v297_v27 = vadd.f32 %v296_v25, %v204_v24  ;;  %v956_v28 = vpop.f32.mrb[3].mxu0 }
  0xf2   : > { %v314_v29 = vmul.f32 1.442695, %v311_v26  ;;  %v309_v30 = vand.u32 2147483647, %v297_v27  ;;  %v306_v62 = vmax.f32 %v297_v27, 0.0  ;;  %v370_v26 = vpop.permute.xlu1 %369 }
  0xf3   : > { %v301_v32 = vpop.f32.mrb[4].mxu0 }
  0xf4   : > { %1045 = vpow2.f32 %v314_v29  ;;  %v312_v33 = vsub.f32 0.0, %v309_v30  ;;  %v302_v34 = vadd.f32 %v301_v32, %v209_v31  ;;  %v959_v35 = vpop.f32.mrb[5].mxu0 }
  0xf6   : > { %v316_v36 = vmul.f32 1.442695, %v312_v33  ;;  %v310_v37 = vand.u32 2147483647, %v302_v34  ;;  %v307_v9 = vmax.f32 %v302_v34, 0.0 }
  0xf8   : > { %1047 = vpow2.f32 %v316_v36  ;;  %v313_v38 = vsub.f32 0.0, %v310_v37 }
  0xfa   : > { %v318_v39 = vmul.f32 1.442695, %v313_v38 }
  0xfc   : > { %1049 = vpow2.f32 %v318_v39 }
  0xfe   : > { %v1046_v40 = vpop.eup %1045 }
  0xff   : > { %v320_v41 = vadd.f32 1.0, %v1046_v40  ;;  %v323_v45 = vmul.f32 -0.5, %v1046_v40  ;;  %v326_v50 = vand.u32 2147483647, %v1046_v40 }
 0x101   : > { %1051 = vlog2.f32 %v320_v41  ;;  %v324_v48 = vadd.f32 1.0, %v323_v45  ;;  %vm327_vm3 = vcmp.lt.f32.partialorder %v326_v50, 0.0004427343 }
 0x102   : > { %v1048_v42 = vpop.eup %1047 }
 0x103   : > { %v329_v43 = vadd.f32 1.0, %v1048_v42  ;;  %v332_v47 = vmul.f32 -0.5, %v1048_v42  ;;  %v335_v54 = vand.u32 2147483647, %v1048_v42  ;;  %v325_v55 = vmul.f32 %v1046_v40, %v324_v48 }
 0x105   : > { %1053 = vlog2.f32 %v329_v43  ;;  %v333_v53 = vadd.f32 1.0, %v332_v47  ;;  %vm336_vm4 = vcmp.lt.f32.partialorder %v335_v54, 0.0004427343 }
 0x106   : > { %v1050_v44 = vpop.eup %1049 }
 0x107   : > { %v338_v46 = vadd.f32 1.0, %v1050_v44  ;;  %v341_v51 = vmul.f32 -0.5, %v1050_v44  ;;  %v334_v60 = vmul.f32 %v1048_v42, %v333_v53  ;;  %v344_v63 = vand.u32 2147483647, %v1050_v44 }
 0x109   : > { %1055 = vlog2.f32 %v338_v46  ;;  %v342_v57 = vadd.f32 1.0, %v341_v51  ;;  %vm345_vm5 = vcmp.lt.f32.partialorder %v344_v63, 0.0004427343 }
 0x10b   : > { %v1052_v49 = vpop.eup %1051  ;;  %v343_v6 = vmul.f32 %v1050_v44, %v342_v57 }
 0x10c   : > { %v322_v52 = vmul.f32 0.6931472, %v1052_v49 }
 0x10e   : > { %v328_v58 = vsel %vm327_vm3, %v325_v55, %v322_v52 }
 0x10f   : > { %v1054_v56 = vpop.eup %1053  ;;  %v347_v3 = vadd.f32 %v328_v58, %v305_v61 }
 0x110   : > { %v331_v59 = vmul.f32 0.6931472, %v1054_v56 }
 0x112   : > { %v337_v1 = vsel %vm336_vm4, %v334_v60, %v331_v59 }
 0x113   : > { %v1056_v2 = vpop.eup %1055  ;;  %v348_v4 = vadd.f32 %v337_v1, %v306_v62 }
 0x114   : > { %v340_v5 = vmul.f32 0.6931472, %v1056_v2 }
 0x115   : > { %v1006_v7 = vpack.c.bf16 %v348_v4, %v347_v3 }
 0x116   : > { %v346_v8 = vsel %vm345_vm5, %v343_v6, %v340_v5  ;;  %v904_v6 = vld [vmem:[%s1306_s2 + $0x18] sm:$0xff] }
 0x117   : > { %1007 = vmatpush3.bf16.msra.mxu1 %v1006_v7  ;;  %v349_v10 = vadd.f32 %v346_v8, %v307_v9  ;;  %v905_v7 = vld [vmem:[%s1306_s2 + $0x20] sm:$0xff]  ;;  %v906_v8 = vld [vmem:[%s1306_s2 + $0x28] sm:$0xf]  ;;  %v521_v9 = vpop.permute.xlu0 %520 }
 0x118   : > { %964 = vmatprep.subr.mxu1 %v1105_v0 }
 0x11b   : > { %965 = vmatpush3.msk.msra.mxu1 %vm221_vm1, %v349_v10 }
 0x11c   : > { %967 = vmatmul.mubr.msk.f32.vlgmr.msra.gmra.mrb[0].mxu1 %vm372_vm6, %v350_v11  ;;  %1011 = vmatprep.subr.bf16.mxu1 %v1108_v18 }
 0x11d   : > { %969 = vmatprep.mubr.msk.f32.mxu1 %vm1106_vm0, %v1105_v0 }
 0x120   : > { %970 = vmatmul.mubr.msk.f32.gmra.mrb[2].mxu1 %vm372_vm6, %v351_v12 }
 0x121   : > { %972 = vmatprep.mubr.msk.f32.mxu1 %vm1106_vm0, %v1105_v0 }
 0x124   : > { %973 = vmatmul.mubr.msk.f32.gmra.mrb[4].mxu1 %vm372_vm6, %v352_v13 }
 0x125   : > { %996 = vmatprep.mubr.msk.f32.mxu1 %vm1106_vm0, %v1105_v0 }
 0x1ef   : > { %v451_v15 = vpop.f32.mrb[0].mxu1 }
 0x1f0   : > { %v452_v16 = vadd.f32 %v451_v15, %v360_v14  ;;  %v968_v17 = vpop.f32.mrb[1].mxu1  ;;  %v526_v14 = vpop.permute.xlu1 %525 }
 0x1f2   : > { %v468_v18 = vand.u32 2147483647, %v452_v16  ;;  %v465_v56 = vmax.f32 %v452_v16, 0.0 }
 0x1f3   : > { %v456_v20 = vpop.f32.mrb[2].mxu1 }
 0x1f4   : > { %v471_v21 = vsub.f32 0.0, %v468_v18  ;;  %v457_v22 = vadd.f32 %v456_v20, %v365_v19  ;;  %v971_v23 = vpop.f32.mrb[3].mxu1 }
 0x1f6   : > { %v474_v24 = vmul.f32 1.442695, %v471_v21  ;;  %v469_v25 = vand.u32 2147483647, %v457_v22  ;;  %v466_v57 = vmax.f32 %v457_v22, 0.0  ;;  %v531_v21 = vpop.permute.xlu0 %530 }
 0x1f7   : > { %v461_v27 = vpop.f32.mrb[4].mxu1 }
 0x1f8   : > { %1057 = vpow2.f32 %v474_v24  ;;  %v472_v28 = vsub.f32 0.0, %v469_v25  ;;  %v462_v29 = vadd.f32 %v461_v27, %v370_v26  ;;  %v974_v30 = vpop.f32.mrb[5].mxu1 }
 0x1fa   : > { %v476_v31 = vmul.f32 1.442695, %v472_v28  ;;  %v470_v32 = vand.u32 2147483647, %v462_v29  ;;  %v467_v4 = vmax.f32 %v462_v29, 0.0 }
 0x1fc   : > { %1059 = vpow2.f32 %v476_v31  ;;  %v473_v33 = vsub.f32 0.0, %v470_v32 }
 0x1fe   : > { %v478_v34 = vmul.f32 1.442695, %v473_v33 }
 0x200   : > { %1061 = vpow2.f32 %v478_v34 }
 0x202   : > { %v1058_v35 = vpop.eup %1057 }
 0x203   : > { %v480_v36 = vadd.f32 1.0, %v1058_v35  ;;  %v483_v40 = vmul.f32 -0.5, %v1058_v35  ;;  %v486_v45 = vand.u32 2147483647, %v1058_v35 }
 0x205   : > { %1063 = vlog2.f32 %v480_v36  ;;  %v484_v43 = vadd.f32 1.0, %v483_v40  ;;  %vm487_vm7 = vcmp.lt.f32.partialorder %v486_v45, 0.0004427343 }
 0x206   : > { %v1060_v37 = vpop.eup %1059 }
 0x207   : > { %v489_v38 = vadd.f32 1.0, %v1060_v37  ;;  %v492_v42 = vmul.f32 -0.5, %v1060_v37  ;;  %v495_v49 = vand.u32 2147483647, %v1060_v37  ;;  %v485_v50 = vmul.f32 %v1058_v35, %v484_v43 }
 0x209   : > { %1065 = vlog2.f32 %v489_v38  ;;  %v493_v47 = vadd.f32 1.0, %v492_v42  ;;  %vm496_vm8 = vcmp.lt.f32.partialorder %v495_v49, 0.0004427343 }
 0x20a   : > { %v1062_v39 = vpop.eup %1061 }
 0x20b   : > { %v498_v41 = vadd.f32 1.0, %v1062_v39  ;;  %v501_v48 = vmul.f32 -0.5, %v1062_v39  ;;  %v494_v54 = vmul.f32 %v1060_v37, %v493_v47  ;;  %v504_v58 = vand.u32 2147483647, %v1062_v39 }
 0x20d   : > { %1067 = vlog2.f32 %v498_v41  ;;  %v502_v55 = vadd.f32 1.0, %v501_v48  ;;  %vm505_vm9 = vcmp.lt.f32.partialorder %v504_v58, 0.0004427343 }
 0x20f   : > { %v1064_v44 = vpop.eup %1063  ;;  %v503_v1 = vmul.f32 %v1062_v39, %v502_v55 }
 0x210   : > { %v482_v46 = vmul.f32 0.6931472, %v1064_v44 }
 0x212   : > { %v488_v52 = vsel %vm487_vm7, %v485_v50, %v482_v46 }
 0x213   : > { %v1066_v51 = vpop.eup %1065  ;;  %v507_v61 = vadd.f32 %v488_v52, %v465_v56 }
 0x214   : > { %v491_v53 = vmul.f32 0.6931472, %v1066_v51 }
 0x216   : > { %v497_v59 = vsel %vm496_vm8, %v494_v54, %v491_v53 }
 0x217   : > { %v1068_v60 = vpop.eup %1067  ;;  %v508_v62 = vadd.f32 %v497_v59, %v466_v57 }
 0x218   : > { %v500_v63 = vmul.f32 0.6931472, %v1068_v60 }
 0x219   : > { %v1009_v2 = vpack.c.bf16 %v508_v62, %v507_v61 }
 0x21a   : > { %v506_v3 = vsel %vm505_vm9, %v503_v1, %v500_v63  ;;  %v914_v1 = vld [vmem:[%s1306_s2 + $0x30] sm:$0xff] }
 0x21b   : > { %1010 = vmatpush3.bf16.msra.mxu0 %v1009_v2  ;;  %v509_v5 = vadd.f32 %v506_v3, %v467_v4  ;;  %v915_v2 = vld [vmem:[%s1306_s2 + $0x38] sm:$0xff]  ;;  %v916_v3 = vld [vmem:[%s1306_s2 + $0x40] sm:$0xf]  ;;  %v681_v4 = vpop.permute.xlu1 %680 }
 0x21c   : > { %979 = vmatprep.subr.mxu0 %v1105_v0 }
 0x21f   : > { %980 = vmatpush3.msk.msra.mxu0 %vm221_vm1, %v509_v5 }
 0x220   : > { %982 = vmatmul.mubr.msk.f32.vlgmr.msra.gmra.mrb[6].mxu0 %vm372_vm6, %v904_v6 }
 0x221   : > { %984 = vmatprep.mubr.msk.f32.mxu0 %vm1106_vm0, %v1105_v0 }
 0x224   : > { %985 = vmatmul.mubr.msk.f32.gmra.mrb[8].mxu0 %vm372_vm6, %v905_v7 }
 0x225   : > { %987 = vmatprep.mubr.msk.f32.mxu0 %vm1106_vm0, %v1105_v0 }
 0x228   : > { %988 = vmatmul.mubr.msk.f32.gmra.mrb[10].mxu0 %vm372_vm6, %v906_v8  ;;  %v686_v8 = vpop.permute.xlu0 %685 }
 0x2f3   : > { %v611_v10 = vpop.f32.mrb[6].mxu0 }
 0x2f4   : > { %v612_v11 = vadd.f32 %v611_v10, %v521_v9  ;;  %v983_v12 = vpop.f32.mrb[7].mxu0 }
 0x2f6   : > { %v628_v13 = vand.u32 2147483647, %v612_v11  ;;  %v625_v51 = vmax.f32 %v612_v11, 0.0 }
 0x2f7   : > { %v616_v15 = vpop.f32.mrb[8].mxu0 }
 0x2f8   : > { %v631_v16 = vsub.f32 0.0, %v628_v13  ;;  %v617_v17 = vadd.f32 %v616_v15, %v526_v14  ;;  %v986_v18 = vpop.f32.mrb[9].mxu0 }
 0x2fa   : > { %v634_v19 = vmul.f32 1.442695, %v631_v16  ;;  %v629_v20 = vand.u32 2147483647, %v617_v17  ;;  %v626_v52 = vmax.f32 %v617_v17, 0.0 }
 0x2fb   : > { %v621_v22 = vpop.f32.mrb[10].mxu0 }
 0x2fc   : > { %1069 = vpow2.f32 %v634_v19  ;;  %v632_v23 = vsub.f32 0.0, %v629_v20  ;;  %v622_v24 = vadd.f32 %v621_v22, %v531_v21  ;;  %v989_v25 = vpop.f32.mrb[11].mxu0 }
 0x2fe   : > { %v636_v26 = vmul.f32 1.442695, %v632_v23  ;;  %v630_v27 = vand.u32 2147483647, %v622_v24  ;;  %v627_v62 = vmax.f32 %v622_v24, 0.0 }
 0x300   : > { %1071 = vpow2.f32 %v636_v26  ;;  %v633_v28 = vsub.f32 0.0, %v630_v27 }
 0x302   : > { %v638_v29 = vmul.f32 1.442695, %v633_v28 }
 0x304   : > { %1073 = vpow2.f32 %v638_v29 }
 0x306   : > { %v1070_v30 = vpop.eup %1069 }
 0x307   : > { %v640_v31 = vadd.f32 1.0, %v1070_v30  ;;  %v643_v35 = vmul.f32 -0.5, %v1070_v30  ;;  %v646_v40 = vand.u32 2147483647, %v1070_v30 }
 0x309   : > { %1075 = vlog2.f32 %v640_v31  ;;  %v644_v38 = vadd.f32 1.0, %v643_v35  ;;  %vm647_vm10 = vcmp.lt.f32.partialorder %v646_v40, 0.0004427343 }
 0x30a   : > { %v1072_v32 = vpop.eup %1071 }
 0x30b   : > { %v649_v33 = vadd.f32 1.0, %v1072_v32  ;;  %v652_v37 = vmul.f32 -0.5, %v1072_v32  ;;  %v655_v44 = vand.u32 2147483647, %v1072_v32  ;;  %v645_v45 = vmul.f32 %v1070_v30, %v644_v38 }
 0x30d   : > { %1077 = vlog2.f32 %v649_v33  ;;  %v653_v42 = vadd.f32 1.0, %v652_v37  ;;  %vm656_vm11 = vcmp.lt.f32.partialorder %v655_v44, 0.0004427343 }
 0x30e   : > { %v1074_v34 = vpop.eup %1073 }
 0x30f   : > { %v658_v36 = vadd.f32 1.0, %v1074_v34  ;;  %v661_v43 = vmul.f32 -0.5, %v1074_v34  ;;  %v654_v49 = vmul.f32 %v1072_v32, %v653_v42  ;;  %v664_v53 = vand.u32 2147483647, %v1074_v34 }
 0x311   : > { %1079 = vlog2.f32 %v658_v36  ;;  %v662_v50 = vadd.f32 1.0, %v661_v43  ;;  %vm665_vm12 = vcmp.lt.f32.partialorder %v664_v53, 0.0004427343 }
 0x313   : > { %v1076_v39 = vpop.eup %1075  ;;  %v663_v59 = vmul.f32 %v1074_v34, %v662_v50 }
 0x314   : > { %v642_v41 = vmul.f32 0.6931472, %v1076_v39 }
 0x316   : > { %v648_v47 = vsel %vm647_vm10, %v645_v45, %v642_v41 }
 0x317   : > { %v1078_v46 = vpop.eup %1077  ;;  %v667_v56 = vadd.f32 %v648_v47, %v625_v51 }
 0x318   : > { %v651_v48 = vmul.f32 0.6931472, %v1078_v46 }
 0x31a   : > { %v657_v54 = vsel %vm656_vm11, %v654_v49, %v651_v48 }
 0x31b   : > { %v1080_v55 = vpop.eup %1079  ;;  %v668_v57 = vadd.f32 %v657_v54, %v626_v52 }
 0x31c   : > { %v660_v58 = vmul.f32 0.6931472, %v1080_v55 }
 0x31d   : > { %v1012_v60 = vpack.c.bf16 %v668_v57, %v667_v56 }
 0x31e   : > { %v666_v61 = vsel %vm665_vm12, %v663_v59, %v660_v58 }
 0x31f   : > { %1013 = vmatpush3.bf16.msra.mxu1 %v1012_v60  ;;  %v669_v63 = vadd.f32 %v666_v61, %v627_v62 }
 0x320   : > { %994 = vmatprep.subr.mxu1 %v1105_v0 }
 0x323   : > { %995 = vmatpush3.msk.msra.mxu1 %vm221_vm1, %v669_v63 }
 0x324   : > { %997 = vmatmul.mubr.msk.f32.vlgmr.msra.gmra.mrb[6].mxu1 %vm372_vm6, %v914_v1 }
 0x325   : > { %999 = vmatprep.mubr.msk.f32.mxu1 %vm1106_vm0, %v1105_v0 }
 0x328   : > { %1000 = vmatmul.mubr.msk.f32.gmra.mrb[8].mxu1 %vm372_vm6, %v915_v2 }
 0x329   : > { %1002 = vmatprep.mubr.msk.f32.mxu1 %vm1106_vm0, %v1105_v0  ;;  %v691_v0 = vpop.permute.xlu1 %690 }
 0x32c   : > { %1003 = vmatmul.mubr.msk.f32.gmra.mrb[10].mxu1 %vm372_vm6, %v916_v3 }
 0x3f7   : > { %v771_v5 = vpop.f32.mrb[6].mxu1 }
 0x3f8   : > { %v772_v6 = vadd.f32 %v771_v5, %v681_v4  ;;  %v998_v7 = vpop.f32.mrb[7].mxu1 }
 0x3fa   : > { %785 = vst [vmem:[%s184_s13] sm:$0xff] %v772_v6 }
 0x3fb   : > { %v776_v9 = vpop.f32.mrb[8].mxu1 }
 0x3fc   : > { %v777_v10 = vadd.f32 %v776_v9, %v686_v8  ;;  %v1001_v11 = vpop.f32.mrb[9].mxu1  ;;  %794 = sbr.rel (!%p1159_p4) target bundleno = 1035 (0x40b), region = 40 }
 0x3fe   : > { %786 = vst [vmem:[%s184_s13 + $0x8] sm:$0xff] %v777_v10 }
 0x3ff   : > { %v781_v12 = vpop.f32.mrb[10].mxu1 }
 0x400   : > { %v782_v13 = vadd.f32 %v781_v12, %v691_v0  ;;  %v1004_v14 = vpop.f32.mrb[11].mxu1 }
 0x401   : > { %v828_v15 = vld [vmem:[%s184_s13] sm:$0xff] (%p1159_p4) }
 0x402   : > { %787 = vst [vmem:[%s184_s13 + $0x10] sm:$0xf] %v782_v13  ;;  %829 = vst [vmem:[%s796_s20] sm:$0xff] (%p1159_p4), %v828_v15 }
 0x405   : > { %v830_v16 = vld [vmem:[%s184_s13 + $0x8] sm:$0xff] }
 0x406   : > { %831 = vst [vmem:[%s796_s20 + $0x18] sm:$0xff] %v830_v16 }
 0x409   : > { %v832_v17 = vld [vmem:[%s184_s13 + $0x10] sm:$0xff] }
 0x40a   : > { %833 = vst [vmem:[%s796_s20 + $0x30] sm:$0xff] %v832_v17 }
 0x40b PF: > { %p11_p8 = scmp.ge.s32.totalorder %s1149_s19, 5   ;;  %s1310_s15 = smov %s1099_s16 }
 0x40c   : > { %s1311_s16 = smov %s1157_s22  ;;  %s1312_s17 = smov %s1149_s19 }
 0x40d   :  { %13 = sbr.rel (!%p11_p8) target bundleno = 2 (0x2), region = 109 }

</bundles_post_ra>
